<compile_context>
chip_gen: v5e
topology: v5e:2x2
jax: 0.10.0
libtpu: 0.0.40
codegen_flags: <defaults>
</compile_context>

<pallas_src>
import functools
import math

import jax
import jax.numpy as jnp
from jax.experimental import pallas as pl
from jax.experimental.pallas import tpu as pltpu


_VMEM_LIMIT_BYTES = 48 * 1024 * 1024     # > default scoped 16/32 MiB, < v7x 64 MiB physical.
_BLOCK_BUDGET_BYTES = 6 * 1024 * 1024    # ~6 MiB/block; can be raised to 8-16 MiB on v5e/v6e.


def _compiler_params(sem):
    return pltpu.CompilerParams(dimension_semantics=sem,
                                vmem_limit_bytes=_VMEM_LIMIT_BYTES)


# ----------------------------- Pallas kernels ------------------------------

def _row_norm_affine_kernel(x_ref, g_ref, b_ref, o_ref, *, eps):
    """Per-row (last-axis) mean/var + affine.

    Serves LayerNorm (g/b are (1, D) per-feature) and fused InstanceNorm
    (rows are (n, c) planes, g/b are (rows, 1) per-row).  Kept as a centered
    two-pass over the VMEM tile for numerical safety (no E[x^2]-E[x]^2
    cancellation); both reductions are VMEM-local so the kernel stays
    HBM-bound.
    """
    x = x_ref[...].astype(jnp.float32)
    mean = jnp.mean(x, axis=-1, keepdims=True)
    xc = x - mean
    var = jnp.mean(xc * xc, axis=-1, keepdims=True)
    y = xc * jax.lax.rsqrt(var + eps)
    o_ref[...] = (y * g_ref[...].astype(jnp.float32)
                  + b_ref[...].astype(jnp.float32)).astype(o_ref.dtype)


def _bn_block_kernel(x_ref, g_ref, b_ref, o_ref, *, eps):
    """BatchNorm2d (train mode): per-channel stats over (N, HW).

    Block is (N, cblk, HW) with cblk >= 8 channels; gamma/beta come in as a
    (cblk, 1, 1) block and broadcast as (cblk, 1) against (N, cblk, HW).
    """
    x = x_ref[...].astype(jnp.float32)              # (N, cblk, HW)
    mean = jnp.mean(x, axis=(0, 2), keepdims=True)
    xc = x - mean
    var = jnp.mean(xc * xc, axis=(0, 2), keepdims=True)
    y = xc * jax.lax.rsqrt(var + eps)
    g = g_ref[...].astype(jnp.float32)[:, 0, :]     # (cblk, 1)
    b = b_ref[...].astype(jnp.float32)[:, 0, :]
    o_ref[...] = (y * g + b).astype(o_ref.dtype)


def _gn_block_kernel(x_ref, g_ref, b_ref, o_ref, *, eps, cg, gpb):
    """GroupNorm: block holds `gpb` whole groups (gpb*cg channels, multiple of
    8 so sublanes stay dense); per-group stats via a static unrolled loop."""
    gall = g_ref[...].astype(jnp.float32)           # (gpb*cg, 1, 1)
    ball = b_ref[...].astype(jnp.float32)
    for k in range(gpb):
        sl = slice(k * cg, (k + 1) * cg)
        x = x_ref[:, sl, :].astype(jnp.float32)     # (1, cg, HW)
        mean = jnp.mean(x)
        xc = x - mean
        var = jnp.mean(xc * xc)
        y = xc * jax.lax.rsqrt(var + eps)
        g = gall[sl, 0, :]                          # (cg, 1) -> bcast (1, cg, HW)
        b = ball[sl, 0, :]
        o_ref[:, sl, :] = (y * g + b).astype(o_ref.dtype)


def _row_stats_kernel(x_ref, sum_ref, ssq_ref, acc_s, acc_q, *, hw_total):
    """Tiled stats pass: per-row sum and sum-of-squares over the HW axis.

    Grid is (row_blocks, hw_blocks) with the HW axis innermost ('arbitrary');
    accumulators live in VMEM scratch; outputs written on the last HW step.
    Partial HW tiles are masked with a lane iota so garbage never enters the
    sums.  f32 accumulation; E[x^2]-E[x]^2 combine happens in the wrapper.
    """
    h = pl.program_id(1)

    @pl.when(h == 0)
    def _():
        acc_s[...] = jnp.zeros_like(acc_s)
        acc_q[...] = jnp.zeros_like(acc_q)

    x = x_ref[...].astype(jnp.float32)              # (rb, hw_t)
    hw_t = x_ref.shape[-1]
    if hw_total % hw_t:                             # static check -> mask only if needed
        lane = jax.lax.broadcasted_iota(jnp.int32, x.shape, 1)
        x = jnp.where(h * hw_t + lane < hw_total, x, 0.0)
    acc_s[...] += jnp.sum(x, axis=-1, keepdims=True)
    acc_q[...] += jnp.sum(x * x, axis=-1, keepdims=True)

    @pl.when(h == pl.num_programs(1) - 1)
    def _():
        sum_ref[...] = acc_s[...]
        ssq_ref[...] = acc_q[...]


def _row_apply_kernel(x_ref, s_ref, t_ref, o_ref):
    """Tiled apply pass: o = x * scale + shift with per-row (rb, 1) params
    (mean/rstd/gamma/beta pre-folded into scale/shift in the wrapper)."""
    x = x_ref[...].astype(jnp.float32)
    o_ref[...] = (x * s_ref[...] + t_ref[...]).astype(o_ref.dtype)


def _pixel_norm_kernel(x_ref, o_ref, *, eps):
    """F.normalize(x, p=2, dim=1) on a (1, C, spatial_tile) block.

    Channel reduce on sublanes (lane axis stays spatial and dense);
    x * rsqrt(max(sumsq, eps^2)) == x / max(||x||, eps) exactly.
    """
    x = x_ref[...].astype(jnp.float32)
    ssq = jnp.sum(x * x, axis=1, keepdims=True)
    o_ref[...] = (x * jax.lax.rsqrt(jnp.maximum(ssq, eps * eps))).astype(o_ref.dtype)


# ----------------------------- tile selection -------------------------------

def _pick_rows(rows, row_bytes, sub=8):
    """Rows (or channels) per block: multiple of `sub` (or the full extent),
    within the VMEM block budget.  If everything would fit one block and the
    problem is big enough, split once so a 2nd TensorCore (v7x) has work;
    that costs only ~0.35us of per-step overhead on single-TC v5e/v6e."""
    if rows <= sub:
        return rows
    fit = max(1, _BLOCK_BUDGET_BYTES // max(row_bytes, 1))
    br = min(rows, fit)
    if br >= rows and rows >= 2 * sub:
        br = -(-rows // 2)
    br = max(sub, (br // sub) * sub)
    return min(br, rows)


def _pick_hw_tile(hw, rb, itemsize):
    """Lane-axis tile for the tiled two-pass path: full rows if they fit the
    budget, otherwise the largest multiple of 128 that does (masked last tile)."""
    cap = max(1, _BLOCK_BUDGET_BYTES // max(rb * itemsize, 1))
    if hw <= cap:
        return hw
    return max(128, (cap // 128) * 128)


# ------------------------------ pallas_call glue ----------------------------

def _row_stats(x2, rb, hw_t):
    R, HW = x2.shape
    return pl.pallas_call(
        functools.partial(_row_stats_kernel, hw_total=HW),
        out_shape=(jax.ShapeDtypeStruct((R, 1), jnp.float32),
                   jax.ShapeDtypeStruct((R, 1), jnp.float32)),
        grid=(pl.cdiv(R, rb), pl.cdiv(HW, hw_t)),
        in_specs=[pl.BlockSpec((rb, hw_t), lambda r, h: (r, h))],
        out_specs=(pl.BlockSpec((rb, 1), lambda r, h: (r, 0)),
                   pl.BlockSpec((rb, 1), lambda r, h: (r, 0))),
        scratch_shapes=[pltpu.VMEM((rb, 1), jnp.float32),
                        pltpu.VMEM((rb, 1), jnp.float32)],
        compiler_params=_compiler_params(("parallel", "arbitrary")),
    )(x2)


def _row_apply(x2, scale, shift, rb, hw_t):
    R, HW = x2.shape
    return pl.pallas_call(
        _row_apply_kernel,
        out_shape=jax.ShapeDtypeStruct((R, HW), x2.dtype),
        grid=(pl.cdiv(R, rb), pl.cdiv(HW, hw_t)),
        in_specs=[pl.BlockSpec((rb, hw_t), lambda r, h: (r, h)),
                  pl.BlockSpec((rb, 1), lambda r, h: (r, 0)),
                  pl.BlockSpec((rb, 1), lambda r, h: (r, 0))],
        out_specs=pl.BlockSpec((rb, hw_t), lambda r, h: (r, h)),
        compiler_params=_compiler_params(("parallel", "parallel")),
    )(x2, scale, shift)


def _tiled_affine_norm(x, weight, bias, eps, mode, groups=32, hw_tile=None):
    """Two-pass tiled path for BN / IN / GN when the fused slab would exceed
    the VMEM block budget: per-(n,c) row sums over HW, then an O(N*C) combine
    in the wrapper, then a fused scale/shift apply sweep."""
    N, C, H, W = x.shape
    HW = H * W
    R = N * C
    itemsize = jnp.dtype(x.dtype).itemsize
    rb = 16 if itemsize == 2 else 8
    hw_t = _pick_hw_tile(HW, rb, itemsize) if hw_tile is None else hw_tile
    x2 = x.reshape(R, HW)

    s, q = _row_stats(x2, rb, hw_t)                 # (R, 1) f32 sums over HW per row
    s = s[:, 0].reshape(N, C)
    q = q[:, 0].reshape(N, C)

    if mode == 'bn':
        cnt = N * HW
        mean_c = s.sum(0) / cnt                     # (C,)
        var_c = jnp.maximum(q.sum(0) / cnt - mean_c * mean_c, 0.0)
        mean = jnp.broadcast_to(mean_c[None, :], (N, C))
        var = jnp.broadcast_to(var_c[None, :], (N, C))
    elif mode == 'in':
        cnt = HW
        mean = s / cnt
        var = jnp.maximum(q / cnt - mean * mean, 0.0)
    else:                                           # 'gn'
        cg = C // groups
        cnt = cg * HW
        mg = s.reshape(N, groups, cg).sum(-1) / cnt
        vg = jnp.maximum(q.reshape(N, groups, cg).sum(-1) / cnt - mg * mg, 0.0)
        mean = jnp.repeat(mg, cg, axis=1)
        var = jnp.repeat(vg, cg, axis=1)

    rstd = jax.lax.rsqrt(var + eps)                 # (N, C) -- tiny O(N*C) wrapper math
    w = jnp.broadcast_to(weight[None, :], (N, C)).astype(jnp.float32)
    b = jnp.broadcast_to(bias[None, :], (N, C)).astype(jnp.float32)
    scale = (rstd * w).reshape(R, 1)
    shift = (b - mean * rstd * w).reshape(R, 1)

    out2 = _row_apply(x2, scale, shift, rb, hw_t)
    return out2.reshape(N, C, H, W)


def _batch_norm(x, weight, bias, eps):
    # Training-mode BatchNorm2d: per-channel stats over (N, HW).
    # TODO(synk): running_mean/running_var buffer updates (eval mode) not modeled.
    N, C, H, W = x.shape
    HW = H * W
    itemsize = jnp.dtype(x.dtype).itemsize
    if N * min(C, 8) * HW * itemsize > _BLOCK_BUDGET_BYTES:
        return _tiled_affine_norm(x, weight, bias, eps, 'bn')
    x3 = x.reshape(N, C, HW)                        # free contiguous reshape
    g3 = weight.reshape(C, 1, 1).astype(jnp.float32)
    b3 = bias.reshape(C, 1, 1).astype(jnp.float32)
    cblk = _pick_rows(C, N * HW * itemsize, sub=8)
    out3 = pl.pallas_call(
        functools.partial(_bn_block_kernel, eps=eps),
        out_shape=jax.ShapeDtypeStruct((N, C, HW), x.dtype),
        grid=(pl.cdiv(C, cblk),),
        in_specs=[pl.BlockSpec((N, cblk, HW), lambda c: (0, c, 0)),
                  pl.BlockSpec((cblk, 1, 1), lambda c: (c, 0, 0)),
                  pl.BlockSpec((cblk, 1, 1), lambda c: (c, 0, 0))],
        out_specs=pl.BlockSpec((N, cblk, HW), lambda c: (0, c, 0)),
        compiler_params=_compiler_params(("parallel",)),
    )(x3, g3, b3)
    return out3.reshape(N, C, H, W)


def _instance_norm(x, weight, bias, eps):
    # InstanceNorm2d(affine=True): per-(n, c) stats over HW, as a batched
    # per-row norm on the (N*C, HW) view (lane-dense HW, >=8 rows per block).
    N, C, H, W = x.shape
    HW = H * W
    R = N * C
    itemsize = jnp.dtype(x.dtype).itemsize
    sub = 16 if itemsize == 2 else 8
    if min(R, sub) * HW * itemsize > _BLOCK_BUDGET_BYTES:
        return _tiled_affine_norm(x, weight, bias, eps, 'in')
    x2 = x.reshape(R, HW)
    g = jnp.broadcast_to(weight[None, :], (N, C)).reshape(R, 1).astype(jnp.float32)
    b = jnp.broadcast_to(bias[None, :], (N, C)).reshape(R, 1).astype(jnp.float32)
    rb = _pick_rows(R, HW * itemsize, sub=sub)
    out2 = pl.pallas_call(
        functools.partial(_row_norm_affine_kernel, eps=eps),
        out_shape=jax.ShapeDtypeStruct((R, HW), x.dtype),
        grid=(pl.cdiv(R, rb),),
        in_specs=[pl.BlockSpec((rb, HW), lambda i: (i, 0)),
                  pl.BlockSpec((rb, 1), lambda i: (i, 0)),
                  pl.BlockSpec((rb, 1), lambda i: (i, 0))],
        out_specs=pl.BlockSpec((rb, HW), lambda i: (i, 0)),
        compiler_params=_compiler_params(("parallel",)),
    )(x2, g, b)
    return out2.reshape(N, C, H, W)


def _group_norm(x, weight, bias, eps, groups=32):
    N, C, H, W = x.shape
    if C % groups != 0:
        raise ValueError(f"GroupNorm needs channels % {groups} == 0, got {C}.")
    cg = C // groups
    HW = H * W
    itemsize = jnp.dtype(x.dtype).itemsize
    # Smallest groups-per-block so the channel block is a multiple of 8 sublanes.
    gpb = 1 if cg % 8 == 0 else 8 // math.gcd(cg, 8)
    if gpb * cg * HW * itemsize > _BLOCK_BUDGET_BYTES:
        return _tiled_affine_norm(x, weight, bias, eps, 'gn', groups=groups)
    # Grow gpb (powers of two dividing `groups`) to amortize grid overhead,
    # keeping >=2 total grid steps so both v7x TensorCores get work.
    while (gpb * 2 <= groups and groups % (gpb * 2) == 0
           and 2 * gpb * cg * HW * itemsize <= _BLOCK_BUDGET_BYTES
           and N * (groups // (gpb * 2)) >= 2):
        gpb *= 2
    cpb = gpb * cg
    x3 = x.reshape(N, C, HW)
    g3 = weight.reshape(C, 1, 1).astype(jnp.float32)
    b3 = bias.reshape(C, 1, 1).astype(jnp.float32)
    out3 = pl.pallas_call(
        functools.partial(_gn_block_kernel, eps=eps, cg=cg, gpb=gpb),
        out_shape=jax.ShapeDtypeStruct((N, C, HW), x.dtype),
        grid=(N, groups // gpb),
        in_specs=[pl.BlockSpec((1, cpb, HW), lambda n, j: (n, j, 0)),
                  pl.BlockSpec((cpb, 1, 1), lambda n, j: (j, 0, 0)),
                  pl.BlockSpec((cpb, 1, 1), lambda n, j: (j, 0, 0))],
        out_specs=pl.BlockSpec((1, cpb, HW), lambda n, j: (n, j, 0)),
        compiler_params=_compiler_params(("parallel", "parallel")),
    )(x3, g3, b3)
    return out3.reshape(N, C, H, W)


def _layer_norm(x2d, gamma2d, beta2d, eps):
    # TODO(synk): D < 128 under-fills the lane axis (masked stores); fold rows
    # into lanes if this path becomes hot with genuinely small D.
    R, D = x2d.shape
    itemsize = jnp.dtype(x2d.dtype).itemsize
    sub = 16 if itemsize == 2 else 8
    br = _pick_rows(R, D * itemsize, sub=sub)
    return pl.pallas_call(
        functools.partial(_row_norm_affine_kernel, eps=eps),
        out_shape=jax.ShapeDtypeStruct((R, D), x2d.dtype),
        grid=(pl.cdiv(R, br),),
        in_specs=[pl.BlockSpec((br, D), lambda i: (i, 0)),
                  pl.BlockSpec((1, D), lambda i: (0, 0)),
                  pl.BlockSpec((1, D), lambda i: (0, 0))],
        out_specs=pl.BlockSpec((br, D), lambda i: (i, 0)),
        compiler_params=_compiler_params(("parallel",)),
    )(x2d, gamma2d, beta2d)


def _pixel_norm(x, eps=1e-12):
    N, C, H, W = x.shape
    HW = H * W
    itemsize = jnp.dtype(x.dtype).itemsize
    x3 = x.reshape(N, C, HW)
    if HW < 128:
        t = HW
    else:
        cap = max(128, (_BLOCK_BUDGET_BYTES // max(C * itemsize, 1)) // 128 * 128)
        t = max(128, min((HW // 128) * 128, cap))
    out3 = pl.pallas_call(
        functools.partial(_pixel_norm_kernel, eps=eps),
        out_shape=jax.ShapeDtypeStruct((N, C, HW), x.dtype),
        grid=(N, pl.cdiv(HW, t)),
        in_specs=[pl.BlockSpec((1, C, t), lambda n, j: (n, 0, j))],
        out_specs=pl.BlockSpec((1, C, t), lambda n, j: (n, 0, j)),
        compiler_params=_compiler_params(("parallel", "parallel")),
    )(x3)
    return out3.reshape(N, C, H, W)


# ------------------------------- NormLayer ----------------------------------

class NormLayer:
    """JAX/Pallas port of the PyTorch NormLayer module (forward pass)."""

    GN_GROUPS = 32

    def __init__(self, channels, normalize_shape=None, norm_type='bn', key=None):
        self.norm_type = norm_type.lower()
        self.channels = channels
        self.normalize_shape = normalize_shape
        self.eps = 1e-5
        if key is None:
            key = jax.random.PRNGKey(0)
        kg, kb = jax.random.split(key)
        if self.norm_type in ('bn', 'in', 'gn'):
            if self.norm_type == 'gn' and channels % self.GN_GROUPS != 0:
                raise ValueError('GroupNorm(32, C) requires C % 32 == 0.')
            # PyTorch default init is weight=1 / bias=0; use deterministic
            # non-trivial values so the affine path is actually exercised.
            self.weight = 1.0 + 0.1 * jax.random.normal(kg, (channels,), jnp.float32)
            self.bias = 0.1 * jax.random.normal(kb, (channels,), jnp.float32)
        elif self.norm_type == 'layer':
            d = int(normalize_shape)
            self.weight = 1.0 + 0.1 * jax.random.normal(kg, (d,), jnp.float32)
            self.bias = 0.1 * jax.random.normal(kb, (d,), jnp.float32)
        elif self.norm_type in ('pixel', 'none'):
            self.weight = None
            self.bias = None
        else:
            raise ValueError(f'Norm type {norm_type} not support.')

    def __call__(self, x):
        t = self.norm_type
        if t == 'bn':
            return _batch_norm(x, self.weight, self.bias, self.eps)
        if t == 'in':
            return _instance_norm(x, self.weight, self.bias, self.eps)
        if t == 'gn':
            return _group_norm(x, self.weight, self.bias, self.eps, self.GN_GROUPS)
        if t == 'pixel':
            return _pixel_norm(x)
        if t == 'layer':
            D = int(self.normalize_shape)
            lead = x.shape[:-1]
            o2 = _layer_norm(x.reshape(-1, D), self.weight.reshape(1, D),
                             self.bias.reshape(1, D), self.eps)
            return o2.reshape(*lead, D)
        return x  # 'none'


# ------------------------------- references ---------------------------------

def _bn_ref(x, w, b, eps):
    mu = x.mean(axis=(0, 2, 3), keepdims=True)
    var = ((x - mu) ** 2).mean(axis=(0, 2, 3), keepdims=True)
    C = x.shape[1]
    return (x - mu) / jnp.sqrt(var + eps) * w.reshape(1, C, 1, 1) + b.reshape(1, C, 1, 1)


def _in_ref(x, w, b, eps):
    mu = x.mean(axis=(2, 3), keepdims=True)
    var = ((x - mu) ** 2).mean(axis=(2, 3), keepdims=True)
    C = x.shape[1]
    return (x - mu) / jnp.sqrt(var + eps) * w.reshape(1, C, 1, 1) + b.reshape(1, C, 1, 1)


def _gn_ref(x, w, b, eps, G=32):
    N, C, H, W = x.shape
    xg = x.reshape(N, G, -1)
    mu = xg.mean(axis=-1, keepdims=True)
    var = ((xg - mu) ** 2).mean(axis=-1, keepdims=True)
    y = ((xg - mu) / jnp.sqrt(var + eps)).reshape(N, C, H, W)
    return y * w.reshape(1, C, 1, 1) + b.reshape(1, C, 1, 1)


def _pixel_ref(x, eps=1e-12):
    nrm = jnp.sqrt(jnp.sum(x * x, axis=1, keepdims=True))
    return x / jnp.maximum(nrm, eps)


def _layer_ref(x, w, b, eps):
    mu = x.mean(axis=-1, keepdims=True)
    var = ((x - mu) ** 2).mean(axis=-1, keepdims=True)
    return (x - mu) / jnp.sqrt(var + eps) * w + b


# ---------------------------------- main -------------------------------------

if __name__ == "__main__":
    key = jax.random.PRNGKey(0)
    k1, k2, k3, kp = jax.random.split(key, 4)

    # Small NCHW tensors: HW=256 (128-aligned) and HW=144 with C=64 (cg=2 for
    # GroupNorm, non-128-multiple spatial -> exercises masked partial tiles).
    x_img = jax.random.normal(k1, (2, 32, 16, 16), jnp.float32)
    x_c64 = jax.random.normal(k2, (2, 64, 12, 12), jnp.float32)
    # Small sequence tensor for LayerNorm(normalize_shape=32).
    x_seq = jax.random.normal(k3, (2, 8, 32), jnp.float32)

    checks = []
    for x in (x_img, x_c64):
        C = x.shape[1]
        bn = NormLayer(C, norm_type='bn', key=kp)
        inorm = NormLayer(C, norm_type='in', key=kp)
        gn = NormLayer(C, norm_type='gn', key=kp)
        px = NormLayer(C, norm_type='pixel', key=kp)

        checks.append((bn(x), _bn_ref(x, bn.weight, bn.bias, bn.eps)))
        checks.append((inorm(x), _in_ref(x, inorm.weight, inorm.bias, inorm.eps)))
        checks.append((gn(x), _gn_ref(x, gn.weight, gn.bias, gn.eps)))
        checks.append((px(x), _pixel_ref(x)))

        # Explicitly exercise the tiled two-pass fallback (hw_tile=128 forces
        # a multi-step, masked lane reduce even at these small shapes).
        checks.append((_tiled_affine_norm(x, bn.weight, bn.bias, bn.eps, 'bn',
                                          hw_tile=128),
                       _bn_ref(x, bn.weight, bn.bias, bn.eps)))
        checks.append((_tiled_affine_norm(x, inorm.weight, inorm.bias, inorm.eps,
                                          'in', hw_tile=128),
                       _in_ref(x, inorm.weight, inorm.bias, inorm.eps)))
        checks.append((_tiled_affine_norm(x, gn.weight, gn.bias, gn.eps, 'gn',
                                          hw_tile=128),
                       _gn_ref(x, gn.weight, gn.bias, gn.eps)))

    ln = NormLayer(32, normalize_shape=32, norm_type='layer', key=kp)
    checks.append((ln(x_seq), _layer_ref(x_seq, ln.weight, ln.bias, ln.eps)))

    idn = NormLayer(32, norm_type='none', key=kp)
    checks.append((idn(x_img), x_img))

    for out, ref in checks:
        out = jax.block_until_ready(out)
        assert out.shape == ref.shape and out.dtype == ref.dtype
        assert jnp.max(jnp.abs(out - ref)) < 1e-4, "mismatch vs reference"

    print("KERNEL_OK")
</pallas_src>

<mosaic_0001>
module attributes {stable_mosaic.version = 11 : i64} {
  func.func @_bn_block_kernel(%arg0: i32, %arg1: memref<2x16x256xf32, #tpu.memory_space<vmem>>, %arg2: memref<16x1x1xf32, #tpu.memory_space<vmem>>, %arg3: memref<16x1x1xf32, #tpu.memory_space<vmem>>, %arg4: memref<2x16x256xf32, #tpu.memory_space<vmem>>) attributes {dimension_semantics = [#tpu.dimension_semantics<parallel>], iteration_bounds = array<i64: 2>, scalar_prefetch = 0 : i64, scratch_operands = 0 : i64, tpu.core_type = #tpu.core_type<tc>, window_params = [{transform_indices = @transform_0, window_bounds = array<i64: 2, 16, 256>}, {transform_indices = @transform_1, window_bounds = array<i64: 16, 1, 1>}, {transform_indices = @transform_2, window_bounds = array<i64: 16, 1, 1>}, {transform_indices = @transform_3, window_bounds = array<i64: 2, 16, 256>}]} {
    %c0 = arith.constant 0 : index
    %c0_0 = arith.constant 0 : index
    %c0_1 = arith.constant 0 : index
    %0 = vector.load %arg1[%c0, %c0_0, %c0_1] : memref<2x16x256xf32, #tpu.memory_space<vmem>>, vector<2x16x256xf32>
    %cst = arith.constant dense<0.000000e+00> : vector<16xf32>
    %1 = vector.multi_reduction <add>, %0, %cst [0, 2] : vector<2x16x256xf32> to vector<16xf32>
    %2 = vector.shape_cast %1 : vector<16xf32> to vector<1x16x1xf32>
    %cst_2 = arith.constant 5.120000e+02 : f32
    %3 = vector.broadcast %cst_2 : f32 to vector<1x16x1xf32>
    %4 = arith.divf %2, %3 : vector<1x16x1xf32>
    %5 = vector.broadcast %4 : vector<1x16x1xf32> to vector<2x16x256xf32>
    %6 = arith.subf %0, %5 : vector<2x16x256xf32>
    %7 = arith.mulf %6, %6 : vector<2x16x256xf32>
    %cst_3 = arith.constant dense<0.000000e+00> : vector<16xf32>
    %8 = vector.multi_reduction <add>, %7, %cst_3 [0, 2] : vector<2x16x256xf32> to vector<16xf32>
    %9 = vector.shape_cast %8 : vector<16xf32> to vector<1x16x1xf32>
    %cst_4 = arith.constant 5.120000e+02 : f32
    %10 = vector.broadcast %cst_4 : f32 to vector<1x16x1xf32>
    %11 = arith.divf %9, %10 : vector<1x16x1xf32>
    %cst_5 = arith.constant 9.99999974E-6 : f32
    %12 = vector.broadcast %cst_5 : f32 to vector<1x16x1xf32>
    %13 = arith.addf %11, %12 : vector<1x16x1xf32>
    %14 = math.rsqrt %13 : vector<1x16x1xf32>
    %15 = vector.broadcast %14 : vector<1x16x1xf32> to vector<2x16x256xf32>
    %16 = arith.mulf %6, %15 : vector<2x16x256xf32>
    %c0_6 = arith.constant 0 : index
    %c0_7 = arith.constant 0 : index
    %c0_8 = arith.constant 0 : index
    %17 = vector.load %arg2[%c0_6, %c0_7, %c0_8] : memref<16x1x1xf32, #tpu.memory_space<vmem>>, vector<16x1x1xf32>
    %18 = vector.shape_cast %17 : vector<16x1x1xf32> to vector<16x1xf32>
    %c0_9 = arith.constant 0 : index
    %c0_10 = arith.constant 0 : index
    %c0_11 = arith.constant 0 : index
    %19 = vector.load %arg3[%c0_9, %c0_10, %c0_11] : memref<16x1x1xf32, #tpu.memory_space<vmem>>, vector<16x1x1xf32>
    %20 = vector.shape_cast %19 : vector<16x1x1xf32> to vector<16x1xf32>
    %21 = vector.shape_cast %18 : vector<16x1xf32> to vector<1x16x1xf32>
    %22 = vector.broadcast %21 : vector<1x16x1xf32> to vector<2x16x256xf32>
    %23 = arith.mulf %16, %22 : vector<2x16x256xf32>
    %24 = vector.shape_cast %20 : vector<16x1xf32> to vector<1x16x1xf32>
    %25 = vector.broadcast %24 : vector<1x16x1xf32> to vector<2x16x256xf32>
    %26 = arith.addf %23, %25 : vector<2x16x256xf32>
    %c0_12 = arith.constant 0 : index
    %c0_13 = arith.constant 0 : index
    %c0_14 = arith.constant 0 : index
    %27 = vector.load %arg4[%c0_12, %c0_13, %c0_14] : memref<2x16x256xf32, #tpu.memory_space<vmem>>, vector<2x16x256xf32>
    tpu.vector_store %arg4[%c0_12, %c0_13, %c0_14], %26 {strides = array<i32>} : memref<2x16x256xf32, #tpu.memory_space<vmem>>, vector<2x16x256xf32>,
    return
  }
  func.func @transform_0(%arg0: i32) -> (i32, i32, i32) {
    %c0_i32 = arith.constant 0 : i32
    %c0_i32_0 = arith.constant 0 : i32
    %c0_i32_1 = arith.constant 0 : i32
    return %c0_i32, %arg0, %c0_i32_0 : i32, i32, i32
  }
  func.func @transform_1(%arg0: i32) -> (i32, i32, i32) {
    %c0_i32 = arith.constant 0 : i32
    %c0_i32_0 = arith.constant 0 : i32
    %c0_i32_1 = arith.constant 0 : i32
    return %arg0, %c0_i32, %c0_i32_0 : i32, i32, i32
  }
  func.func @transform_2(%arg0: i32) -> (i32, i32, i32) {
    %c0_i32 = arith.constant 0 : i32
    %c0_i32_0 = arith.constant 0 : i32
    %c0_i32_1 = arith.constant 0 : i32
    return %arg0, %c0_i32, %c0_i32_0 : i32, i32, i32
  }
  func.func @transform_3(%arg0: i32) -> (i32, i32, i32) {
    %c0_i32 = arith.constant 0 : i32
    %c0_i32_0 = arith.constant 0 : i32
    %c0_i32_1 = arith.constant 0 : i32
    return %c0_i32, %arg0, %c0_i32_0 : i32, i32, i32
  }
}

</mosaic_0001>

<bundles_post_ra>
// kernel: tpu_custom_call.1
= control target key start
LH: loop header
LB: loop body
LE: loop exit
PB: predicated region body
PF: predicated region fallthrough
CT: control target
= control target key end

     0   :  { %8 = vsyncpa [#allocation3], 0  ;;  %s1489_s0 = inlined_call_operand.hbm [shape: f32[2,32,256], index: 0, kind: input, shape index: {}]   ;;  %s1490_s1 = inlined_call_operand.vmem [shape: f32[32,1,1], index: 1, kind: input, shape index: {}]   ;;  %s1491_s2 = inlined_call_operand.vmem [shape: f32[32,1,1], index: 2, kind: input, shape index: {}]   ;;  %s1492_s3 = inlined_call_operand.hbm [shape: f32[2,32,256], index: 3, kind: output, shape index: {}]  }
   0x1   :  { %10 = vsyncpa [#allocation3 + $0x1], 0 }
   0x2   :  { %11 = vsyncpa [#allocation4], 0 }
   0x3   :  { %13 = vsyncpa [#allocation4 + $0x1], 0  ;;  %s1040_s12 = smov 0   ;;  %s1042_s13 = smov 0  }
   0x4   :  { %s1044_s14 = smov 0   ;;  %s1046_s15 = smov 0  }
   0x5 LB: > { %s1061_s16 = sadd.s32 4294967295, %s1003_s15   ;;  %s863_s17 = sadd.s32 4294967294, %s1003_s15   ;;  %s1003_s15 = sphi %s1046_s15, %s1500_s15   ;;  %s999_s14 = sphi %s1044_s14, %s1499_s14   ;;  %s995_s13 = sphi %s1042_s13, %s1498_s13   ;;  %s991_s12 = sphi %s1040_s12, %s1497_s12  }
   0x6   : > { %s1065_s18 = sadd.s32 1, %s1003_s15   ;;  %s26_s19 = sadd.s32 1, %s999_s14 }
   0x7   : > { %s23_s20 = ssub.s32 %s1003_s15, %s1065_s18  ;;  %p33_p0 = scmp.ne.s32.totalorder %s999_s14, %s995_s13 }
   0x8   : > { %p24_p1 = scmp.eq.s32.totalorder %s23_s20, 0  ;;  %p34_p2 = scmp.eq.s32.totalorder %s1003_s15, 0 }
   0x9   : > { %p39_p3 = scmp.ne.s32.totalorder %s995_s13, %s991_s12  ;;  %p40_p4 = scmp.eq.s32.totalorder %s1061_s16, 0 }
   0xa   : > { %s1077_s21 = scalar_select %p24_p1, %s999_s14, %s26_s19  }
   0xb   : > { %p1079_p5 = por %p34_p2, %p33_p0  ;;  %p1083_p6 = por %p40_p4, %p39_p3 }
   0xc   : > { %p115_p7 = scmp.eq.s32.totalorder %s1061_s16, 1  ;;  %p121_p8 = scmp.eq.s32.totalorder %s863_s17, 1 }
   0xd   : > { %p865_p11 = scmp.ge.s32.totalorder %s1003_s15, 2 }
   0xe   : > { %p1088_p9 = por %p115_p7, %p33_p0  ;;  %p1092_p10 = por %p121_p8, %p39_p3 }
   0xf   : > { %137 = sbr.rel (%p865_p11) target bundleno = 34 (0x22), region = 16 }
  0x14   : > { %s141_s26 = sand.u32 1, %s999_s14   ;;  %s884_s27 = sshll.u32 %s1003_s15, 5 }
  0x15   : > { %s866_s28 = sshll.u32 %s141_s26, 6  ;;  %s151_s4 = scalar_lea.hbm %s1489_s0, %s884_s27 }
  0x16   : > { %s887_s5 = scalar_select %p1079_p5, [#allocation0], [#allocation10] }
  0x17   : > { %s164_s6 = sshll.u32 %s151_s4, 4  ;;  %s145_s7 = scalar_lea.vmem [#allocation2], %s866_s28  ;;  %s165_s6 = int_to_ptr.hbm [resolvable:$true] %s164_s6 }
  0x18   : > { %s166_s8 = sshll.u32 %s145_s7, 4  ;;  %s156_s9 = sld [smem:[%s887_s5]]   ;;  %s167_s8 = int_to_ptr.vmem [resolvable:$true] %s166_s8 }
  0x19   : > { %s1005_s10 = smov 1024   ;;  %s1006_s11 = smov 512  }
  0x1a   : > { %888 = sst [smem:[#allocation7]] (%p1079_p5), %s1005_s10  ;;  %s1007_s17 = smov 2  }
  0x1b   : > { %889 = sst [smem:[#allocation7 + $0x1]] (%p1079_p5), %s1006_s11  ;;  %s1008_s19 = smov 256  }
  0x1c   : > { %890 = sst [smem:[#allocation7 + $0x2]] (%p1079_p5), %s1007_s17  ;;  %s1009_s28 = smov 16  }
  0x1d   : > { %891 = sst [smem:[#allocation7 + $0x3]] (%p1079_p5), %s1008_s19  ;;  %s142_s29 = scalar_lea.sflag [#allocation3], %s141_s26 }
  0x1e   : > { %s870_s20 = sshll.u32 %s156_s9, 26  ;;  %892 = sst [smem:[#allocation7 + $0x4]] (%p1079_p5), %s1008_s19 }
  0x1f   : > { %s871_s27 = sadd.s32 134217728, %s870_s20  ;;  %893 = sst [smem:[#allocation7 + $0x5]] (%p1079_p5), %s1009_s28 }
  0x20   : > { %s1010_s30 = smov [#allocation6]  }
  0x21   : > { %894 = dma.general (%p1079_p5), %s165_s6, 1024, %s167_s8, %s142_s29, %s1010_s30, [#allocation7], %s871_s27, 0  }
  0x22 PF: > { %p872_p12 = scmp.ge.s32.totalorder %s1003_s15, 1  ;;  %p203_p13 = scmp.lt.s32.totalorder %s1003_s15, 3 }
  0x24   : > { %p204_p0 = pnand %p872_p12, %p203_p13 }
  0x25   : > { %s1123_s4 = sand.u32 (!%p204_p0), 1, %s995_s13  }
  0x26   : > { %207 = sbr.rel (%p204_p0) target bundleno = 381 (0x17d), region = 32  ;;  %s873_s5 = sshll.u32 (!%p204_p0), %s1123_s4, 6 }
  0x27   : > { %s210_s7 = scalar_lea.sflag (!%p204_p0), [#allocation3], %s1123_s4  ;;  %s1129_s26 = scalar_lea.vmem (!%p204_p0), [#allocation2], %s873_s5 }
  0x2b   : > { %982 = dma.done.wait (%p1083_p6), %s210_s7, 1024  }
  0x2c   : > { %984 = vsyncadd (%p1083_p6), %s210_s7, 4294966272  ;;  %s875_s22 = sshll.u32 %s1061_s16, 4  ;;  %v1011_v0 = vmov 0   ;;  %v1147_v3 = vld [vmem:[%s1129_s26] sm:$0xff]  ;;  %v1150_v4 = vld [vmem:[%s1129_s26 + $0x8] sm:$0xff]  ;;  %v1012_v47 = vmov 512.0  }
  0x2d   : > { %958 = vset.pattern.permute.xlu1 %v1011_v0  ;;  %956 = vset.pattern.permute.xlu2 %v1011_v0  ;;  %p247_p1 = scmp.lt.s32.totalorder %s875_s22, 31  ;;  %v1153_v5 = vld [vmem:[%s1129_s26 + $0x20] sm:$0xff]  ;;  %v265_v6 = vadd.f32 %v1150_v4, %v1147_v3  ;;  %v1158_v7 = vld [vmem:[%s1129_s26 + $0x10] sm:$0xff]  ;;  %v1161_v8 = vld [vmem:[%s1129_s26 + $0x28] sm:$0xff]  ;;  %959 = vrcp.f32 %v1012_v47  ;;  %s1399_s17 = scalar_lea.vmem [#allocation5], %s873_s5 }
  0x2e   : > { %957 = vset.pattern.permute.xlu0 %v1011_v0  ;;  %v1164_v9 = vld [vmem:[%s1129_s26 + $0x18] sm:$0xff]  ;;  %v1170_v12 = vld [vmem:[%s1129_s26 + $0x30] sm:$0xff]  ;;  %s733_s19 = scalar_lea.sflag [#allocation4], %s1123_s4 }
  0x2f   : > { %s1502_s22 = smov (!%p247_p1, %s875_s22), 31  ;;  %v266_v10 = vadd.f32 %v265_v6, %v1153_v5  ;;  %v270_v11 = vadd.f32 %v1164_v9, %v1158_v7  ;;  %v1177_v17 = vld [vmem:[%s1129_s26 + $0x38] sm:$0xff] }
  0x30   : > { %s1142_s8 = scalar_lea.vmem %s1490_s1, %s1502_s22  ;;  %s1188_s11 = scalar_lea.vmem %s1491_s2, %s1502_s22 }
  0x31   : > { %v345_v1 = vld [vmem:[%s1142_s8 + $0x3] sm:$0x1]  ;;  %v342_v2 = vld [vmem:[%s1142_s8] sm:$0x1]  ;;  %v267_v13 = vadd.f32 %v266_v10, %v1161_v8  ;;  %v350_v14 = vld [vmem:[%s1142_s8 + $0x8] sm:$0x1]  ;;  %v271_v16 = vadd.f32 %v270_v11, %v1170_v12 }
  0x32   : > { %394 = vperm.xlu1 %958, %v345_v1   ;;  %376 = vperm.xlu2 %956, %v342_v2   ;;  %v343_v15 = vld [vmem:[%s1142_s8 + $0x1] sm:$0x1]  ;;  %v352_v19 = vld [vmem:[%s1142_s8 + $0xa] sm:$0x1]  ;;  %v346_v20 = vld [vmem:[%s1142_s8 + $0x4] sm:$0x1] }
  0x33   : > { %268 = vadd.xlane.f32.xlu0 %v267_v13  ;;  %v272_v18 = vadd.f32 %v271_v16, %v1177_v17  ;;  %v355_v21 = vld [vmem:[%s1142_s8 + $0xd] sm:$0x1]  ;;  %v347_v22 = vld [vmem:[%s1142_s8 + $0x5] sm:$0x1]  ;;  %v358_v23 = vld [vmem:[%s1188_s11] sm:$0x1]  ;;  %v960_v50 = vpop.eup %959 }
  0x34   : > { %v348_v24 = vld [vmem:[%s1142_s8 + $0x6] sm:$0x1]  ;;  %v344_v25 = vld [vmem:[%s1142_s8 + $0x2] sm:$0x1]  ;;  %v361_v26 = vld [vmem:[%s1188_s11 + $0x3] sm:$0x1]  ;;  %vm280_vm0 = vweird.f32 %v960_v50 }
  0x35   : > { %v349_v27 = vld [vmem:[%s1142_s8 + $0x7] sm:$0x1]  ;;  %v353_v28 = vld [vmem:[%s1142_s8 + $0xb] sm:$0x1]  ;;  %v364_v29 = vld [vmem:[%s1188_s11 + $0x6] sm:$0x1] }
  0x36   : > { %v351_v30 = vld [vmem:[%s1142_s8 + $0x9] sm:$0x1]  ;;  %v356_v31 = vld [vmem:[%s1142_s8 + $0xe] sm:$0x1]  ;;  %v354_v33 = vld [vmem:[%s1142_s8 + $0xc] sm:$0x1] }
  0x37   : > { %v367_v32 = vld [vmem:[%s1188_s11 + $0x9] sm:$0x1]  ;;  %v359_v34 = vld [vmem:[%s1188_s11 + $0x1] sm:$0x1]  ;;  %v370_v35 = vld [vmem:[%s1188_s11 + $0xc] sm:$0x1] }
  0x38   : > { %v357_v36 = vld [vmem:[%s1142_s8 + $0xf] sm:$0x1]  ;;  %v362_v37 = vld [vmem:[%s1188_s11 + $0x4] sm:$0x1]  ;;  %v360_v38 = vld [vmem:[%s1188_s11 + $0x2] sm:$0x1] }
  0x39   : > { %v365_v39 = vld [vmem:[%s1188_s11 + $0x7] sm:$0x1]  ;;  %v363_v40 = vld [vmem:[%s1188_s11 + $0x5] sm:$0x1]  ;;  %v368_v41 = vld [vmem:[%s1188_s11 + $0xa] sm:$0x1] }
  0x3a   : > { %424 = vperm.xlu1 %958, %v350_v14   ;;  %382 = vperm.xlu2 %956, %v343_v15   ;;  %v366_v42 = vld [vmem:[%s1188_s11 + $0x8] sm:$0x1]  ;;  %v371_v43 = vld [vmem:[%s1188_s11 + $0xd] sm:$0x1]  ;;  %v369_v46 = vld [vmem:[%s1188_s11 + $0xb] sm:$0x1] }
  0x3b   : > { %273 = vadd.xlane.f32.xlu0 %v272_v18  ;;  %v372_v51 = vld [vmem:[%s1188_s11 + $0xe] sm:$0x1]  ;;  %v276_v52 = vmul.f32 512.0, %v960_v50 }
  0x3d   : > { %v277_v55 = vsub.f32 1.0, %v276_v52  ;;  %v373_v52 = vld [vmem:[%s1188_s11 + $0xf] sm:$0x1] }
  0x3f   : > { %v278_v56 = vmul.f32 %v960_v50, %v277_v55 }
  0x41   : > { %v279_v61 = vadd.f32 %v960_v50, %v278_v56 }
  0x42   : > { %436 = vperm.xlu1 %958, %v352_v19   ;;  %400 = vperm.xlu2 %956, %v346_v20  }
  0x43   : > { %v1238_v62 = vsel %vm280_vm0, %v960_v50, %v279_v61 }
  0x4a   : > { %454 = vperm.xlu1 %958, %v355_v21   ;;  %406 = vperm.xlu2 %956, %v347_v22  }
  0x4f   : > { %388 = vperm.xlu0 %957, %v344_v25  }
  0x52   : > { %551 = vperm.xlu1 %958, %v358_v23   ;;  %412 = vperm.xlu2 %956, %v348_v24  }
  0x57   : > { %442 = vperm.xlu0 %957, %v353_v28  }
  0x5a   : > { %569 = vperm.xlu1 %958, %v361_v26   ;;  %418 = vperm.xlu2 %956, %v349_v27  }
  0x5f   : > { %460 = vperm.xlu0 %957, %v356_v31  }
  0x62   : > { %587 = vperm.xlu1 %958, %v364_v29   ;;  %430 = vperm.xlu2 %956, %v351_v30  }
  0x67   : > { %557 = vperm.xlu0 %957, %v359_v34  }
  0x6a   : > { %605 = vperm.xlu1 %958, %v367_v32   ;;  %448 = vperm.xlu2 %956, %v354_v33  }
  0x6f   : > { %575 = vperm.xlu0 %957, %v362_v37  }
  0x72   : > { %623 = vperm.xlu1 %958, %v370_v35   ;;  %466 = vperm.xlu2 %956, %v357_v36  }
  0x77   : > { %593 = vperm.xlu0 %957, %v365_v39  }
  0x7a   : > { %563 = vperm.xlu2 %956, %v360_v38  }
  0x7f   : > { %611 = vperm.xlu0 %957, %v368_v41  }
  0x82   : > { %581 = vperm.xlu2 %956, %v363_v40  }
  0x87   : > { %629 = vperm.xlu0 %957, %v371_v43  }
  0x8a   : > { %599 = vperm.xlu2 %956, %v366_v42  }
  0x8c   : > { %v1211_v44 = vpop.permute.xlu2 %376 }
  0x8d   : > { %v379_v45 = vperm.slane %v1211_v44, 0 }
  0x8f   : > { %486 = vst [vmem:[#allocation1] ss:$9 sm:$0xff] %v379_v45 }
  0x92   : > { %617 = vperm.xlu2 %956, %v369_v46  }
  0x94   : > { %v1217_v48 = vpop.permute.xlu2 %382 }
  0x95   : > { %v385_v49 = vperm.slane %v1217_v48, 0 }
  0x97   : > { %488 = vst [vmem:[#allocation1 + $0x1] ss:$9 sm:$0xff] %v385_v49 }
  0x9a   : > { %635 = vperm.xlu2 %956, %v372_v51  }
  0x9c   : > { %v1223_v53 = vpop.permute.xlu2 %400 }
  0x9d   : > { %v403_v54 = vperm.slane %v1223_v53, 0 }
  0x9f   : > { %494 = vst [vmem:[#allocation1 + $0x4] ss:$9 sm:$0xff] %v403_v54 }
  0xa4   : > { %v1228_v57 = vpop.permute.xlu1 %394  ;;  %v1230_v58 = vpop.permute.xlu2 %406 }
  0xa5   : > { %v397_v59 = vperm.slane %v1228_v57, 0  ;;  %v409_v60 = vperm.slane %v1230_v58, 0 }
  0xa6   : > { %v269_v63 = vpop.xlane.xlu0 %268 }
  0xa7   : > { %492 = vst [vmem:[#allocation1 + $0x3] ss:$9 sm:$0xff] %v397_v59  ;;  %v282_v0 = vmul.f32 %v1238_v62, %v269_v63 }
  0xa8   : > { %496 = vst [vmem:[#allocation1 + $0x5] ss:$9 sm:$0xff] %v409_v60 }
  0xa9   : > { %v1245_v6 = vsub.f32 %v1147_v3, %v282_v0  ;;  %v1248_v10 = vsub.f32 %v1150_v4, %v282_v0  ;;  %v1251_v11 = vsub.f32 %v1153_v5, %v282_v0  ;;  %v1256_v13 = vsub.f32 %v1161_v8, %v282_v0 }
  0xab   : > { %v292_v14 = vmul.f32 %v1245_v6, %v1245_v6  ;;  %v293_v15 = vmul.f32 %v1248_v10, %v1248_v10  ;;  %v296_v3 = vmul.f32 %v1251_v11, %v1251_v11  ;;  %v297_v19 = vmul.f32 %v1256_v13, %v1256_v13 }
  0xac   : > { %v1241_v1 = vpop.permute.xlu2 %412  ;;  %v425_v30 = vpop.permute.xlu1 %424 }
  0xad   : > { %v415_v2 = vperm.slane %v1241_v1, 0  ;;  %v300_v4 = vadd.f32 %v293_v15, %v292_v14  ;;  %v427_v38 = vperm.slane %v425_v30, 0 }
  0xae   : > { %v274_v16 = vpop.xlane.xlu0 %273 }
  0xaf   : > { %498 = vst [vmem:[#allocation1 + $0x6] ss:$9 sm:$0xff] %v415_v2  ;;  %v283_v5 = vmul.f32 %v1238_v62, %v274_v16  ;;  %v301_v20 = vadd.f32 %v300_v4, %v296_v3 }
  0xb1   : > { %v1268_v21 = vsub.f32 %v1158_v7, %v283_v5  ;;  %v1271_v22 = vsub.f32 %v1164_v9, %v283_v5  ;;  %v302_v23 = vadd.f32 %v301_v20, %v297_v19  ;;  %v1274_v24 = vsub.f32 %v1170_v12, %v283_v5 }
  0xb2   : > { %v1277_v25 = vsub.f32 %v1177_v17, %v283_v5 }
  0xb3   : > { %303 = vadd.xlane.f32.xlu1 %v302_v23  ;;  %v294_v26 = vmul.f32 %v1268_v21, %v1268_v21  ;;  %v295_v27 = vmul.f32 %v1271_v22, %v1271_v22  ;;  %v298_v7 = vmul.f32 %v1274_v24, %v1274_v24 }
  0xb4   : > { %v419_v18 = vpop.permute.xlu2 %418  ;;  %v299_v28 = vmul.f32 %v1277_v25, %v1277_v25  ;;  %v437_v34 = vpop.permute.xlu1 %436 }
  0xb5   : > { %v421_v8 = vperm.slane %v419_v18, 0  ;;  %v305_v9 = vadd.f32 %v295_v27, %v294_v26  ;;  %v439_v36 = vperm.slane %v437_v34, 0 }
  0xb7   : > { %500 = vst [vmem:[#allocation1 + $0x7] ss:$9 sm:$0xff] %v421_v8  ;;  %v306_v12 = vadd.f32 %v305_v9, %v298_v7 }
  0xb9   : > { %v307_v31 = vadd.f32 %v306_v12, %v299_v28 }
  0xbb   : > { %308 = vadd.xlane.f32.xlu1 %v307_v31 }
  0xbc   : > { %v431_v29 = vpop.permute.xlu2 %430  ;;  %v455_v43 = vpop.permute.xlu1 %454 }
  0xbd   : > { %v433_v37 = vperm.slane %v431_v29, 0  ;;  %v457_v47 = vperm.slane %v455_v43, 0 }
  0xc1   : > { %v389_v17 = vpop.permute.xlu0 %388 }
  0xc2   : > { %v391_v33 = vperm.slane %v389_v17, 0 }
  0xc4   : > { %v449_v32 = vpop.permute.xlu2 %448  ;;  %490 = vst [vmem:[#allocation1 + $0x2] ss:$9 sm:$0xff] %v391_v33  ;;  %v1300_v63 = vpop.permute.xlu1 %551 }
  0xc5   : > { %v451_v39 = vperm.slane %v449_v32, 0  ;;  %v554_v1 = vperm.slane %v1300_v63, 0 }
  0xc9   : > { %v443_v35 = vpop.permute.xlu0 %442 }
  0xca   : > { %v445_v50 = vperm.slane %v443_v35, 0 }
  0xcb   : > { %v1287_v40 = vld [vmem:[#allocation1] sm:$0xff]  ;;  %v1289_v41 = vld [vmem:[#allocation1 + $0x9] sm:$0xff] }
  0xcc   : > { %505 = vst [vmem:[#allocation1 + $0x2] ss:$9 sm:$0xff] %v439_v36  ;;  %v467_v42 = vpop.permute.xlu2 %466 }
  0xcd   : > { %503 = vst [vmem:[#allocation1] ss:$9 sm:$0xff] %v427_v38  ;;  %v469_v46 = vperm.slane %v467_v42, 0 }
  0xce   : > { %504 = vst [vmem:[#allocation1 + $0x1] ss:$9 sm:$0xff] %v433_v37 }
  0xcf   : > { %507 = vst [vmem:[#allocation1 + $0x4] ss:$9 sm:$0xff] %v451_v39 }
  0xd0   : > { %508 = vst [vmem:[#allocation1 + $0x5] ss:$9 sm:$0xff] %v457_v47 }
  0xd1   : > { %510 = vst [vmem:[#allocation1 + $0x7] ss:$9 sm:$0xff] %v469_v46  ;;  %v461_v51 = vpop.permute.xlu0 %460 }
  0xd2   : > { %506 = vst [vmem:[#allocation1 + $0x3] ss:$9 sm:$0xff] %v445_v50  ;;  %v463_v55 = vperm.slane %v461_v51, 0 }
  0xd4   : > { %509 = vst [vmem:[#allocation1 + $0x6] ss:$9 sm:$0xff] %v463_v55  ;;  %641 = vperm.xlu1 %958, %v373_v52   ;;  %v1304_v0 = vpop.permute.xlu2 %563 }
  0xd5   : > { %v566_v15 = vperm.slane %v1304_v0, 0 }
  0xd9   : > { %v1312_v44 = vpop.permute.xlu0 %557 }
  0xda   : > { %v560_v4 = vperm.slane %v1312_v44, 0 }
  0xdb   : > { %v1292_v56 = vld [vmem:[#allocation1] sm:$0xff]  ;;  %v1294_v61 = vld [vmem:[#allocation1 + $0x9] sm:$0xff] }
  0xdc   : > { %513 = vst [vmem:[#allocation1] ss:$9 sm:$0xff] %v379_v45  ;;  %v1314_v45 = vpop.permute.xlu1 %569  ;;  %v1320_v57 = vpop.permute.xlu2 %581 }
  0xdd   : > { %514 = vst [vmem:[#allocation1 + $0x1] ss:$9 sm:$0xff] %v385_v49  ;;  %v572_v3 = vperm.slane %v1314_v45, 0  ;;  %v584_v16 = vperm.slane %v1320_v57, 0 }
  0xde   : > { %515 = vst [vmem:[#allocation1 + $0x2] ss:$9 sm:$0xff] %v391_v33 }
  0xdf   : > { %516 = vst [vmem:[#allocation1 + $0x3] ss:$9 sm:$0xff] %v397_v59 }
  0xe0   : > { %517 = vst [vmem:[#allocation1 + $0x4] ss:$9 sm:$0xff] %v403_v54 }
  0xe1   : > { %518 = vst [vmem:[#allocation1 + $0x5] ss:$9 sm:$0xff] %v409_v60  ;;  %v1322_v53 = vpop.permute.xlu0 %575 }
  0xe2   : > { %519 = vst [vmem:[#allocation1 + $0x6] ss:$9 sm:$0xff] %v415_v2  ;;  %v578_v5 = vperm.slane %v1322_v53, 0 }
  0xe3   : > { %520 = vst [vmem:[#allocation1 + $0x7] ss:$9 sm:$0xff] %v421_v8 }
  0xe4   : > { %v1324_v54 = vpop.permute.xlu1 %587  ;;  %v1326_v58 = vpop.permute.xlu2 %599 }
  0xe5   : > { %v590_v60 = vperm.slane %v1324_v54, 0  ;;  %v602_v26 = vperm.slane %v1326_v58, 0 }
  0xe9   : > { %v1328_v59 = vpop.permute.xlu0 %593 }
  0xea   : > { %v1316_v48 = vld [vmem:[#allocation1] sm:$0xff]  ;;  %v1318_v49 = vld [vmem:[#allocation1 + $0x9] sm:$0xff]  ;;  %v596_v19 = vperm.slane %v1328_v59, 0 }
  0xeb   : > { %523 = vst [vmem:[#allocation1] ss:$9 sm:$0xff] %v427_v38 }
  0xec   : > { %524 = vst [vmem:[#allocation1 + $0x1] ss:$9 sm:$0xff] %v433_v37  ;;  %v1349_v18 = vpop.permute.xlu1 %605  ;;  %v1354_v20 = vpop.permute.xlu2 %617 }
  0xed   : > { %525 = vst [vmem:[#allocation1 + $0x2] ss:$9 sm:$0xff] %v439_v36  ;;  %v608_v27 = vperm.slane %v1349_v18, 0  ;;  %v620_v29 = vperm.slane %v1354_v20, 0 }
  0xee   : > { %526 = vst [vmem:[#allocation1 + $0x3] ss:$9 sm:$0xff] %v445_v50 }
  0xef   : > { %527 = vst [vmem:[#allocation1 + $0x4] ss:$9 sm:$0xff] %v451_v39 }
  0xf0   : > { %528 = vst [vmem:[#allocation1 + $0x5] ss:$9 sm:$0xff] %v457_v47 }
  0xf1   : > { %529 = vst [vmem:[#allocation1 + $0x6] ss:$9 sm:$0xff] %v463_v55  ;;  %v1356_v8 = vpop.permute.xlu0 %611 }
  0xf2   : > { %530 = vst [vmem:[#allocation1 + $0x7] ss:$9 sm:$0xff] %v469_v46  ;;  %v614_v31 = vperm.slane %v1356_v8, 0 }
  0xf4   : > { %v1364_v23 = vpop.permute.xlu1 %623  ;;  %v1368_v28 = vpop.permute.xlu2 %635 }
  0xf5   : > { %v626_v30 = vperm.slane %v1364_v23, 0  ;;  %v638_v17 = vperm.slane %v1368_v28, 0 }
  0xf9   : > { %v1332_v2 = vld [vmem:[#allocation1] sm:$0xff]  ;;  %v1334_v14 = vld [vmem:[#allocation1 + $0x9] sm:$0xff]  ;;  %v1370_v12 = vpop.permute.xlu0 %629 }
  0xfa   : > { %673 = vst [vmem:[#allocation1 + $0x6] ss:$9 sm:$0xff] %v590_v60  ;;  %v632_v32 = vperm.slane %v1370_v12, 0 }
  0xfb   : > { %661 = vst [vmem:[#allocation1] ss:$9 sm:$0xff] %v554_v1 }
  0xfc   : > { %665 = vst [vmem:[#allocation1 + $0x2] ss:$9 sm:$0xff] %v566_v15 }
  0xfd   : > { %667 = vst [vmem:[#allocation1 + $0x3] ss:$9 sm:$0xff] %v572_v3 }
  0xfe   : > { %671 = vst [vmem:[#allocation1 + $0x5] ss:$9 sm:$0xff] %v584_v16 }
  0xff   : > { %663 = vst [vmem:[#allocation1 + $0x1] ss:$9 sm:$0xff] %v560_v4 }
 0x100   : > { %669 = vst [vmem:[#allocation1 + $0x4] ss:$9 sm:$0xff] %v578_v5 }
 0x101   : > { %675 = vst [vmem:[#allocation1 + $0x7] ss:$9 sm:$0xff] %v596_v19 }
 0x108   : > { %v676_v7 = vld [vmem:[#allocation1] sm:$0xff]  ;;  %v677_v9 = vld [vmem:[#allocation1 + $0x9] sm:$0xff] }
 0x109   : > { %678 = vst [vmem:[#allocation1] ss:$9 sm:$0xff] %v602_v26 }
 0x10a   : > { %679 = vst [vmem:[#allocation1 + $0x1] ss:$9 sm:$0xff] %v608_v27 }
 0x10b   : > { %681 = vst [vmem:[#allocation1 + $0x3] ss:$9 sm:$0xff] %v620_v29 }
 0x10c   : > { %682 = vst [vmem:[#allocation1 + $0x4] ss:$9 sm:$0xff] %v626_v30 }
 0x10d   : > { %684 = vst [vmem:[#allocation1 + $0x6] ss:$9 sm:$0xff] %v638_v17 }
 0x10e   : > { %680 = vst [vmem:[#allocation1 + $0x2] ss:$9 sm:$0xff] %v614_v31 }
 0x10f   : > { %683 = vst [vmem:[#allocation1 + $0x5] ss:$9 sm:$0xff] %v632_v32 }
 0x126   : > { %v304_v33 = vpop.xlane.xlu1 %303 }
 0x127   : > { %v310_v34 = vmul.f32 %v304_v33, %v1238_v62 }
 0x129   : > { %v312_v35 = vadd.f32 1e-05, %v310_v34 }
 0x12b   : > { %961 = vrsqrt.f32 %v312_v35  ;;  %vm320_vm2 = vweird.f32 %v312_v35 }
 0x12e   : > { %v309_v36 = vpop.xlane.xlu1 %308 }
 0x12f   : > { %v311_v37 = vmul.f32 %v309_v36, %v1238_v62 }
 0x131   : > { %v962_v38 = vpop.eup %961  ;;  %v313_v39 = vadd.f32 1e-05, %v311_v37 }
 0x132   : > { %v315_v42 = vmul.f32 %v962_v38, %v312_v35  ;;  %vm321_vm1 = vweird.f32 %v962_v38 }
 0x133   : > { %963 = vrsqrt.f32 %v313_v39  ;;  %vm322_vm3 = vmor %vm320_vm2, %vm321_vm1  ;;  %vm330_vm5 = vweird.f32 %v313_v39 }
 0x134   : > { %v316_v43 = vmul.f32 %v962_v38, %v315_v42 }
 0x136   : > { %v317_v46 = vmul.f32 0.5, %v316_v43 }
 0x138   : > { %v318_v47 = vsub.f32 1.5, %v317_v46 }
 0x139   : > { %v964_v50 = vpop.eup %963 }
 0x13a   : > { %v319_v51 = vmul.f32 %v962_v38, %v318_v47  ;;  %v325_v52 = vmul.f32 %v964_v50, %v313_v39  ;;  %vm331_vm4 = vweird.f32 %v964_v50 }
 0x13b   : > { %vm332_vm6 = vmor %vm330_vm5, %vm331_vm4 }
 0x13c   : > { %v323_v55 = vsel %vm322_vm3, %v962_v38, %v319_v51  ;;  %v326_v62 = vmul.f32 %v964_v50, %v325_v52 }
 0x13d   : > { %v334_v33 = vmul.f32 %v323_v55, %v1245_v6  ;;  %v335_v34 = vmul.f32 %v323_v55, %v1248_v10 }
 0x13e   : > { %v327_v46 = vmul.f32 0.5, %v326_v62 }
 0x13f   : > { %v541_v36 = vmul.f32 %v1287_v40, %v334_v33  ;;  %v542_v37 = vmul.f32 %v1289_v41, %v335_v34 }
 0x140   : > { %v328_v35 = vsub.f32 1.5, %v327_v46 }
 0x141   : > { %v716_v42 = vadd.f32 %v676_v7, %v541_v36  ;;  %v717_v43 = vadd.f32 %v677_v9, %v542_v37 }
 0x142   : > { %v329_v47 = vmul.f32 %v964_v50, %v328_v35 }
 0x143   : > { %724 = vst [vmem:[%s1399_s17] sm:$0xff] %v716_v42 }
 0x144   : > { %725 = vst [vmem:[%s1399_s17 + $0x8] sm:$0xff] %v717_v43  ;;  %v333_v10 = vsel %vm332_vm6, %v964_v50, %v329_v47 }
 0x145   : > { %v336_v40 = vmul.f32 %v333_v10, %v1268_v21  ;;  %v337_v41 = vmul.f32 %v333_v10, %v1271_v22 }
 0x146   : > { %v642_v38 = vpop.permute.xlu1 %641 }
 0x147   : > { %v644_v6 = vperm.slane %v642_v38, 0  ;;  %v543_v51 = vmul.f32 %v1292_v56, %v336_v40  ;;  %v544_v39 = vmul.f32 %v1294_v61, %v337_v41  ;;  %v338_v56 = vmul.f32 %v323_v55, %v1251_v11 }
 0x148   : > { %v339_v61 = vmul.f32 %v323_v55, %v1256_v13 }
 0x149   : > { %685 = vst [vmem:[#allocation1 + $0x7] ss:$9 sm:$0xff] %v644_v6  ;;  %v545_v44 = vmul.f32 %v1316_v48, %v338_v56  ;;  %v340_v48 = vmul.f32 %v333_v10, %v1274_v24 }
 0x14a   : > { %v546_v45 = vmul.f32 %v1318_v49, %v339_v61  ;;  %v341_v49 = vmul.f32 %v333_v10, %v1277_v25 }
 0x14b   : > { %v547_v57 = vmul.f32 %v1332_v2, %v340_v48 }
 0x14c   : > { %v548_v53 = vmul.f32 %v1334_v14, %v341_v49 }
 0x150   : > { %v686_v7 = vld [vmem:[#allocation1] sm:$0xff]  ;;  %v687_v9 = vld [vmem:[#allocation1 + $0x9] sm:$0xff] }
 0x151   : > { %688 = vst [vmem:[#allocation1] ss:$9 sm:$0xff] %v554_v1  ;;  %v718_v21 = vadd.f32 %v686_v7, %v543_v51  ;;  %v719_v22 = vadd.f32 %v687_v9, %v544_v39 }
 0x152   : > { %689 = vst [vmem:[#allocation1 + $0x1] ss:$9 sm:$0xff] %v560_v4 }
 0x153   : > { %690 = vst [vmem:[#allocation1 + $0x2] ss:$9 sm:$0xff] %v566_v15 }
 0x154   : > { %691 = vst [vmem:[#allocation1 + $0x3] ss:$9 sm:$0xff] %v572_v3 }
 0x155   : > { %692 = vst [vmem:[#allocation1 + $0x4] ss:$9 sm:$0xff] %v578_v5 }
 0x156   : > { %693 = vst [vmem:[#allocation1 + $0x5] ss:$9 sm:$0xff] %v584_v16 }
 0x157   : > { %694 = vst [vmem:[#allocation1 + $0x6] ss:$9 sm:$0xff] %v590_v60 }
 0x158   : > { %695 = vst [vmem:[#allocation1 + $0x7] ss:$9 sm:$0xff] %v596_v19 }
 0x159   : > { %726 = vst [vmem:[%s1399_s17 + $0x10] sm:$0xff] %v718_v21 }
 0x15a   : > { %727 = vst [vmem:[%s1399_s17 + $0x18] sm:$0xff] %v719_v22 }
 0x15f   : > { %v696_v63 = vld [vmem:[#allocation1] sm:$0xff]  ;;  %v697_v0 = vld [vmem:[#allocation1 + $0x9] sm:$0xff] }
 0x160   : > { %698 = vst [vmem:[#allocation1] ss:$9 sm:$0xff] %v602_v26  ;;  %v720_v11 = vadd.f32 %v696_v63, %v545_v44  ;;  %v721_v13 = vadd.f32 %v697_v0, %v546_v45 }
 0x161   : > { %699 = vst [vmem:[#allocation1 + $0x1] ss:$9 sm:$0xff] %v608_v27 }
 0x162   : > { %700 = vst [vmem:[#allocation1 + $0x2] ss:$9 sm:$0xff] %v614_v31 }
 0x163   : > { %701 = vst [vmem:[#allocation1 + $0x3] ss:$9 sm:$0xff] %v620_v29 }
 0x164   : > { %702 = vst [vmem:[#allocation1 + $0x4] ss:$9 sm:$0xff] %v626_v30 }
 0x165   : > { %703 = vst [vmem:[#allocation1 + $0x5] ss:$9 sm:$0xff] %v632_v32 }
 0x166   : > { %704 = vst [vmem:[#allocation1 + $0x6] ss:$9 sm:$0xff] %v638_v17 }
 0x167   : > { %705 = vst [vmem:[#allocation1 + $0x7] ss:$9 sm:$0xff] %v644_v6 }
 0x168   : > { %728 = vst [vmem:[%s1399_s17 + $0x20] sm:$0xff] %v720_v11 }
 0x169   : > { %729 = vst [vmem:[%s1399_s17 + $0x28] sm:$0xff] %v721_v13 }
 0x16e   : > { %v706_v54 = vld [vmem:[#allocation1] sm:$0xff]  ;;  %v707_v58 = vld [vmem:[#allocation1 + $0x9] sm:$0xff] }
 0x16f   : > { %v722_v59 = vadd.f32 %v706_v54, %v547_v57  ;;  %v723_v60 = vadd.f32 %v707_v58, %v548_v53 }
 0x171   : > { %730 = vst [vmem:[%s1399_s17 + $0x30] sm:$0xff] %v722_v59 }
 0x172   : > { %731 = vst [vmem:[%s1399_s17 + $0x38] sm:$0xff] %v723_v60 }
 0x173   : > { %s886_s20 = sshll.u32 %s1061_s16, 5  ;;  %s756_s27 = sshll.u32 %s1399_s17, 4  ;;  %s757_s27 = int_to_ptr.vmem [resolvable:$true] %s756_s27 }
 0x174   : > { %s745_s30 = scalar_lea.hbm %s1492_s3, %s886_s20  ;;  %s1013_s7 = smov 512  }
 0x175   : > { %s758_s5 = sshll.u32 %s745_s30, 4  ;;  %896 = sst [smem:[#allocation9]] (%p1088_p9), %s1013_s7  ;;  %s759_s5 = int_to_ptr.hbm [resolvable:$true] %s758_s5 }
 0x176   : > { %s1014_s4 = smov 1024   ;;  %s1015_s26 = smov 2  }
 0x177   : > { %897 = sst [smem:[#allocation9 + $0x1]] (%p1088_p9), %s1014_s4  ;;  %s1016_s16 = smov 256  }
 0x178   : > { %898 = sst [smem:[#allocation9 + $0x2]] (%p1088_p9), %s1015_s26  ;;  %s1017_s22 = smov 16  }
 0x179   : > { %899 = sst [smem:[#allocation9 + $0x3]] (%p1088_p9), %s1016_s16  ;;  %s1018_s6 = smov [#allocation8]  }
 0x17a   : > { %900 = sst [smem:[#allocation9 + $0x4]] (%p1088_p9), %s1016_s16  ;;  %s1019_s23 = smov 0  }
 0x17b   : > { %901 = sst [smem:[#allocation9 + $0x5]] (%p1088_p9), %s1017_s22 }
 0x17c   : > { %902 = dma.general (%p1088_p9), %s757_s27, 1024, %s759_s5, %s733_s19, %s1018_s6, [#allocation9], %s1019_s23, 0  }
 0x17d PF: > { %s786_s8 = sand.u32 1, %s991_s12   ;;  %p905_p2 = pnand %p865_p11, %p1092_p10 }
 0x17e   : > { %s787_s9 = scalar_lea.sflag [#allocation4], %s786_s8 }
 0x17f   : > { %p906_p3 = pneg %p905_p2 }
 0x181   : > { %986 = dma.done.wait (%p906_p3), %s787_s9, 1024  }
 0x182   : > { %988 = vsyncadd (%p906_p3), %s787_s9, 4294966272  ;;  %p16_p4 = scmp.ge.s32.totalorder %s1065_s18, 4   ;;  %s1497_s12 = smov %s995_s13 }
 0x183   : > { %s1498_s13 = smov %s999_s14  ;;  %s1499_s14 = smov %s1077_s21 }
 0x184   : > { %s1500_s15 = smov %s1065_s18  ;;  %18 = sbr.rel (!%p16_p4) target bundleno = 5 (0x5), region = 107 }
 0x189   :  { %793 = vsyncpa [#allocation3], 1 }
 0x18a   :  { %795 = vsyncpa [#allocation3 + $0x1], 1 }
 0x18b   :  { %796 = vsyncpa [#allocation4], 1 }
 0x18c   :  { %798 = vsyncpa [#allocation4 + $0x1], 1 }

</bundles_post_ra>
